<compile_context>
chip_gen: v5e
topology: v5e:2x2
jax: 0.10.0
libtpu: 0.0.40
codegen_flags: <defaults>
</compile_context>

<pallas_src>
import math

import jax
import jax.numpy as jnp
import numpy as np
from jax.experimental import pallas as pl
from jax.experimental.pallas import tpu as pltpu


def _round_up(x, m):
    return (x + m - 1) // m * m


# Double-buffered per-step footprint target; safe on v7x (64 MiB / TC,
# 32 MiB scoped default).  v5e/v6e (128 MiB) trivially satisfy it too.
_VMEM_TILE_BUDGET = 24 * 1024 * 1024


def _tile_vmem_bytes(tile_m, cin, kout, in_item, out_item):
    # Double-buffered X + output tiles, resident W (counted twice to be
    # conservative), tiny f32 bias.
    return (2 * tile_m * cin * in_item
            + 2 * cin * kout * in_item
            + 2 * kout * 4
            + 2 * tile_m * kout * out_item)


def _choose_tile_m(m, cin, kout, in_item, out_item):
    """Rows of input pixels processed per grid step.

    * 16-row alignment (bf16 packs two rows per sublane).
    * Large problems: biggest of {2048,1024,512,256} that fits the VMEM
      budget while leaving >= 2 grid steps (v7x dual-TC sharding).
    * Tiny problems: one tile — splitting only adds per-step overhead.
    """
    if m < 512:
        return _round_up(max(m, 16), 16)
    for t in (2048, 1024, 512, 256):
        if _tile_vmem_bytes(t, cin, kout, in_item, out_item) > _VMEM_TILE_BUDGET:
            continue
        if 2 * t <= _round_up(m, 256) or t == 256:
            return t
    return 256


def _deconv_matmul_kernel(x_ref, w_ref, b_ref, o_ref):
    # One MXU matmul per tile of input pixels; f32 accumulation + f32 bias,
    # downcast only at the store (o_ref may be bf16).
    acc = jnp.dot(x_ref[...], w_ref[...], preferred_element_type=jnp.float32)
    o_ref[...] = (acc + b_ref[...]).astype(o_ref.dtype)


def _deconv_taps_matmul(x_flat, w_flat, b_flat, *, out_dtype):
    m, cin = x_flat.shape
    _, kout = w_flat.shape
    assert kout % 128 == 0, "output lane dim must be 128-dense (pad cout)"

    in_item = jnp.dtype(x_flat.dtype).itemsize
    out_item = jnp.dtype(out_dtype).itemsize
    tile_m = _choose_tile_m(m, cin, kout, in_item, out_item)
    grid = (pl.cdiv(m, tile_m),)  # partial last block -> masked store, no pad copy

    footprint = _tile_vmem_bytes(tile_m, cin, kout, in_item, out_item)
    vmem_limit = int(min(max(2 * footprint, 16 * 1024 * 1024),
                         32 * 1024 * 1024))

    cost = pl.CostEstimate(
        flops=2 * m * cin * kout,
        transcendentals=0,
        bytes_accessed=(m * cin * in_item + cin * kout * in_item
                        + kout * 4 + m * kout * out_item))

    return pl.pallas_call(
        _deconv_matmul_kernel,
        out_shape=jax.ShapeDtypeStruct((m, kout), out_dtype),
        grid_spec=pltpu.PrefetchScalarGridSpec(
            num_scalar_prefetch=0,
            grid=grid,
            in_specs=[
                pl.BlockSpec((tile_m, cin), lambda i: (i, 0)),   # streaming X
                pl.BlockSpec((cin, kout), lambda i: (0, 0)),     # resident W
                pl.BlockSpec((1, kout), lambda i: (0, 0)),       # resident bias
            ],
            out_specs=pl.BlockSpec((tile_m, kout), lambda i: (i, 0)),
        ),
        compiler_params=pltpu.CompilerParams(
            dimension_semantics=("parallel",),
            vmem_limit_bytes=vmem_limit),
        cost_estimate=cost,
    )(x_flat, w_flat, b_flat)


class DownRightShiftedDeconv2d:
    """JAX/Pallas port of down_right_shifted_deconv2d (NCHW in / NCHW out)."""

    def __init__(self, num_filters_in, num_filters_out, filter_size=(2, 2),
                 stride=(2, 2), key=None, compute_dtype=jnp.bfloat16,
                 result_dtype=jnp.float32):
        if tuple(stride) != tuple(filter_size):
            raise ValueError(
                "Pallas down_right_shifted_deconv2d supports only the "
                "non-overlapping stride == filter_size configuration used by "
                f"PixelCNN++ (got stride={tuple(stride)}, "
                f"filter_size={tuple(filter_size)}); overlapping taps would "
                "need per-tap scatter-add and PyTorch itself rejects them "
                "with output_padding=1.")
        if key is None:
            key = jax.random.PRNGKey(0)
        kv, kb = jax.random.split(key)
        kh, kw = filter_size
        bound = 1.0 / np.sqrt(num_filters_in * kh * kw)
        # weight_norm(ConvTranspose2d): v has the ConvTranspose2d weight shape
        # (Cin, Cout, kh, kw); g (default dim=0) has shape (Cin, 1, 1, 1) and
        # is initialised to ||v|| so that the initial effective weight == v.
        self.v = jax.random.uniform(
            kv, (num_filters_in, num_filters_out, kh, kw),
            jnp.float32, -bound, bound)
        self.g = jnp.sqrt(jnp.sum(self.v * self.v, axis=(1, 2, 3),
                                  keepdims=True))
        self.bias = jax.random.uniform(
            kb, (num_filters_out,), jnp.float32, -bound, bound)
        self.filter_size = (kh, kw)
        self.stride = tuple(stride)
        self.cout = num_filters_out
        self.compute_dtype = compute_dtype
        self.result_dtype = result_dtype

    def weight(self):
        # weight-norm: w = g * v / ||v||   (norm over dims 1,2,3)
        v_norm = jnp.sqrt(jnp.sum(self.v * self.v, axis=(1, 2, 3),
                                  keepdims=True))
        return self.g * self.v / v_norm        # (Cin, Cout, kh, kw)

    def __call__(self, x):                     # x: NCHW
        n, cin, h, w = x.shape
        kh, kw = self.filter_size
        sh, sw = self.stride
        cout = self.cout
        tap = kh * kw

        compute_dtype = jnp.dtype(self.compute_dtype)
        exact_f32 = compute_dtype == jnp.dtype(jnp.float32)
        # bf16 kernel output: the kernel is HBM-write bound (K = Cin small),
        # so halving the stored bytes is the biggest lever; it also halves the
        # post-kernel transpose traffic.  f32 compute_dtype keeps exact f32.
        kernel_out_dtype = jnp.float32 if exact_f32 else jnp.bfloat16

        # --- lane-dense output: pad cout so KOUT is a multiple of 128 -------
        cout_mult = 128 // math.gcd(128, tap)
        cout_pad = _round_up(cout, cout_mult)
        kout = tap * cout_pad

        weight = self.weight()                                 # (Cin,Cout,kh,kw)
        bias = self.bias
        if cout_pad != cout:
            weight = jnp.pad(weight,
                             ((0, 0), (0, cout_pad - cout), (0, 0), (0, 0)))
            bias = jnp.pad(bias, (0, cout_pad - cout))
        # columns ordered (tap_h, tap_w, cout_pad)
        w_flat = jnp.transpose(weight, (0, 2, 3, 1)).reshape(cin, kout)
        w_flat = w_flat.astype(compute_dtype)
        b_flat = jnp.tile(bias, (tap,)).reshape(1, kout).astype(jnp.float32)

        # --- flatten pixels; cast BEFORE the layout transpose ----------------
        # (so the XLA NCHW->NHWC transpose moves 2-byte elements); no M pad.
        m = n * h * w
        x_flat = jnp.transpose(x.astype(compute_dtype),
                               (0, 2, 3, 1)).reshape(m, cin)

        y = _deconv_taps_matmul(x_flat, w_flat, b_flat,
                                out_dtype=kernel_out_dtype)     # (m, kout)

        # --- tap interleave (pixel-shuffle) fused with NHWC->NCHW ------------
        # out[n, co, ih*kh + p, iw*kw + q] = y[n, ih, iw, p, q, co]
        # Done in the (usually bf16) kernel output dtype; cast at the very end.
        y = y.reshape(n, h, w, kh, kw, cout_pad)
        if cout_pad != cout:
            y = y[..., :cout]
        y = jnp.transpose(y, (0, 5, 1, 3, 2, 4)).reshape(n, cout, h * kh, w * kw)

        # ConvTranspose2d full output height = (h-1)*sh + kh + output_padding(=1)
        # cropped to (... - kh + 1) = (h-1)*sh + 2 (no-op for 2x2 filters).
        h_crop = (h - 1) * sh + 2
        w_crop = (w - 1) * sw + 2
        if h_crop != h * kh or w_crop != w * kw:
            y = y[:, :, :h_crop, :w_crop]
        return y.astype(self.result_dtype)


def reference_deconv(x, weight, bias, filter_size, stride):
    """Plain-JAX reference of ConvTranspose2d(output_padding=1) + crop (NCHW)."""
    n, cin, h, w = x.shape
    kh, kw = filter_size
    sh, sw = stride
    cout = weight.shape[1]
    h_full = (h - 1) * sh + kh + 1
    w_full = (w - 1) * sw + kw + 1
    out = jnp.zeros((n, cout, h_full, w_full), jnp.float32)
    for p in range(kh):
        for q in range(kw):
            contrib = jnp.einsum('nchw,cd->ndhw', x, weight[:, :, p, q])
            out = out.at[:, :, p:p + h * sh:sh, q:q + w * sw:sw].add(contrib)
    out = out + bias[None, :, None, None]
    return out[:, :, :h_full - kh + 1, :w_full - kw + 1]


if __name__ == "__main__":
    key = jax.random.PRNGKey(0)
    kx, kp = jax.random.split(key)

    N, Cin, H, W = 2, 4, 16, 16
    Cout = 8
    x = jax.random.normal(kx, (N, Cin, H, W), jnp.float32)

    mod = DownRightShiftedDeconv2d(Cin, Cout, filter_size=(2, 2),
                                   stride=(2, 2), key=kp)

    # Fast path (bf16 MXU inputs + bf16 kernel output, f32 accumulation/bias).
    y = jax.block_until_ready(mod(x))
    assert y.shape == (N, Cout, 2 * H, 2 * W), y.shape
    assert y.dtype == jnp.float32, y.dtype

    ref = reference_deconv(x, mod.weight(), mod.bias,
                           mod.filter_size, mod.stride)
    np.testing.assert_allclose(np.asarray(y), np.asarray(ref),
                               rtol=3e-2, atol=3e-2)

    # Exact f32 path through the same kernel (explicit opt-in for parity).
    mod.compute_dtype = jnp.float32
    y32 = jax.block_until_ready(mod(x))
    np.testing.assert_allclose(np.asarray(y32), np.asarray(ref),
                               rtol=1e-5, atol=1e-5)

    print("KERNEL_OK")
</pallas_src>

<mosaic_0001>
module attributes {stable_mosaic.version = 11 : i64} {
  func.func @_deconv_matmul_kernel(%arg0: i32, %arg1: memref<256x4xbf16, #tpu.memory_space<vmem>>, %arg2: memref<4x128xbf16, #tpu.memory_space<vmem>>, %arg3: memref<1x128xf32, #tpu.memory_space<vmem>>, %arg4: memref<256x128xbf16, #tpu.memory_space<vmem>>) attributes {dimension_semantics = [#tpu.dimension_semantics<parallel>], iteration_bounds = array<i64: 2>, scalar_prefetch = 0 : i64, scratch_operands = 0 : i64, tpu.core_type = #tpu.core_type<tc>, window_params = [{transform_indices = @transform_0, window_bounds = array<i64: 256, 4>}, {pipeline_mode = #tpu.pipeline_mode<synchronous>, transform_indices = @transform_1, window_bounds = array<i64: 4, 128>}, {pipeline_mode = #tpu.pipeline_mode<synchronous>, transform_indices = @transform_2, window_bounds = array<i64: 1, 128>}, {transform_indices = @transform_3, window_bounds = array<i64: 256, 128>}]} {
    %c0 = arith.constant 0 : index
    %c0_0 = arith.constant 0 : index
    %0 = vector.load %arg1[%c0, %c0_0] : memref<256x4xbf16, #tpu.memory_space<vmem>>, vector<256x4xbf16>
    %c0_1 = arith.constant 0 : index
    %c0_2 = arith.constant 0 : index
    %1 = vector.load %arg2[%c0_1, %c0_2] : memref<4x128xbf16, #tpu.memory_space<vmem>>, vector<4x128xbf16>
    %cst = arith.constant dense<0.000000e+00> : vector<256x128xf32>
    %2 = tpu.matmul %0, %1, %cst {dimension_numbers = #tpu.dot_dimension_numbers<[1], [0], [0], [1], [0, 0, 1, 1], [], []>} : vector<256x4xbf16>, vector<4x128xbf16>, vector<256x128xf32> -> vector<256x128xf32>
    %c0_3 = arith.constant 0 : index
    %c0_4 = arith.constant 0 : index
    %3 = vector.load %arg3[%c0_3, %c0_4] : memref<1x128xf32, #tpu.memory_space<vmem>>, vector<1x128xf32>
    %4 = vector.broadcast %3 : vector<1x128xf32> to vector<256x128xf32>
    %5 = arith.addf %2, %4 : vector<256x128xf32>
    %6 = arith.truncf %5 : vector<256x128xf32> to vector<256x128xbf16>
    %c0_5 = arith.constant 0 : index
    %c0_6 = arith.constant 0 : index
    %7 = vector.load %arg4[%c0_5, %c0_6] : memref<256x128xbf16, #tpu.memory_space<vmem>>, vector<256x128xbf16>
    tpu.vector_store %arg4[%c0_5, %c0_6], %6 {strides = array<i32>} : memref<256x128xbf16, #tpu.memory_space<vmem>>, vector<256x128xbf16>,
    return
  }
  func.func @transform_0(%arg0: i32) -> (i32, i32) {
    %c0_i32 = arith.constant 0 : i32
    %c0_i32_0 = arith.constant 0 : i32
    return %arg0, %c0_i32 : i32, i32
  }
  func.func @transform_1(%arg0: i32) -> (i32, i32) {
    %c0_i32 = arith.constant 0 : i32
    %c0_i32_0 = arith.constant 0 : i32
    %c0_i32_1 = arith.constant 0 : i32
    return %c0_i32, %c0_i32_0 : i32, i32
  }
  func.func @transform_2(%arg0: i32) -> (i32, i32) {
    %c0_i32 = arith.constant 0 : i32
    %c0_i32_0 = arith.constant 0 : i32
    %c0_i32_1 = arith.constant 0 : i32
    return %c0_i32, %c0_i32_0 : i32, i32
  }
  func.func @transform_3(%arg0: i32) -> (i32, i32) {
    %c0_i32 = arith.constant 0 : i32
    %c0_i32_0 = arith.constant 0 : i32
    return %arg0, %c0_i32 : i32, i32
  }
}

</mosaic_0001>

<bundles_post_ra>
// kernel: tpu_custom_call.1
= control target key start
LH: loop header
LB: loop body
LE: loop exit
PB: predicated region body
PF: predicated region fallthrough
CT: control target
= control target key end

     0   :  { %8 = vsyncpa [#allocation3], 0  ;;  %s1072_s0 = inlined_call_operand.vmem [shape: bf16[512,4], index: 0, kind: input, shape index: {}]   ;;  %s1073_s1 = inlined_call_operand.vmem [shape: bf16[4,128], index: 1, kind: input, shape index: {}]   ;;  %s1074_s2 = inlined_call_operand.vmem [shape: f32[1,128], index: 2, kind: input, shape index: {}]   ;;  %s1075_s3 = inlined_call_operand.hbm [shape: bf16[512,128], index: 3, kind: output, shape index: {}]  }
   0x1   :  { %10 = vsyncpa [#allocation3 + $0x1], 0  ;;  %s909_s12 = smov 0   ;;  %s911_s13 = smov 0  }
   0x2   :  { %s913_s14 = smov 0   ;;  %s915_s15 = smov 0  }
   0x3 LB: > { %s930_s16 = sadd.s32 4294967295, %s885_s15   ;;  %s574_s17 = sadd.s32 4294967294, %s885_s15   ;;  %s885_s15 = sphi %s915_s15, %s1081_s15   ;;  %s881_s14 = sphi %s913_s14, %s1080_s14   ;;  %s877_s13 = sphi %s911_s13, %s1079_s13   ;;  %s873_s12 = sphi %s909_s12, %s1078_s12  }
   0x4   : > { %s934_s18 = sadd.s32 1, %s885_s15   ;;  %s91_s19 = sadd.s32 1, %s881_s14 }
   0x5   : > { %s88_s20 = ssub.s32 %s885_s15, %s934_s18  ;;  %p101_p0 = scmp.ne.s32.totalorder %s881_s14, %s877_s13 }
   0x6   : > { %p89_p1 = scmp.eq.s32.totalorder %s88_s20, 0  ;;  %p102_p2 = scmp.eq.s32.totalorder %s930_s16, 1 }
   0x7   : > { %p107_p3 = scmp.ne.s32.totalorder %s877_s13, %s873_s12  ;;  %p108_p4 = scmp.eq.s32.totalorder %s574_s17, 1 }
   0x8   : > { %s945_s21 = scalar_select %p89_p1, %s881_s14, %s91_s19  }
   0x9   : > { %p947_p5 = por %p102_p2, %p101_p0  ;;  %p951_p6 = por %p108_p4, %p107_p3 }
   0xa   : > { %p577_p7 = scmp.ge.s32.totalorder %s885_s15, 1  ;;  %p141_p8 = scmp.lt.s32.totalorder %s885_s15, 3 }
   0xc   : > { %p142_p9 = pnand %p577_p7, %p141_p8 }
   0xd   : > { %s579_s26 = sshll.u32 (!%p142_p9), %s930_s16, 5  ;;  %s162_s4 = sand.u32 (!%p142_p9), 1, %s877_s13  }
   0xe   : > { %145 = sbr.rel (%p142_p9) target bundleno = 222 (0xde), region = 32  ;;  %p166_p10 = scmp.lt.s32.totalorder (!%p142_p9), %s579_s26, 63 }
   0xf   : > { %s578_s7 = sshll.u32 (!%p142_p9), %s162_s4, 7  ;;  %s682_s9 = sshll.u32 (!%p142_p9), %s930_s16, 7 }
  0x10   : > { %s992_s8 = scalar_lea.vmem (!%p142_p9), [#allocation2], %s578_s7  ;;  %s508_s17 = scalar_lea.hbm (!%p142_p9), %s1075_s3, %s682_s9 }
  0x11   : > { %s509_s19 = sshll.u32 (!%p142_p9), %s992_s8, 4  ;;  %s511_s20 = sshll.u32 (!%p142_p9), %s508_s17, 4  ;;  %s510_s19 = int_to_ptr.vmem [resolvable:$true] %s509_s19  ;;  %s512_s20 = int_to_ptr.hbm [resolvable:$true] %s511_s20 }
  0x12   : > { %s497_s16 = scalar_lea.sflag (!%p142_p9), [#allocation3], %s162_s4  ;;  %s837_s24 = sshra.s32 (!%p142_p9), %s512_s20, 4  ;;  %s838_s24 = int_to_ptr.hbm [resolvable:$true] %s837_s24 }
  0x13   : > { %v205_v0 = vld [vmem:[%s1073_s1] sm:$0x3]  ;;  %vm339_vm0 = vcmask 1041408   ;;  %s1083_s26 = smov (!%p166_p10, %s579_s26), 63  ;;  %vm290_vm1 = vcmask 31744   ;;  %s839_s25 = scalar_lea.hbm %s838_s24, 128 }
  0x14   : > { %v341_v1 = vsel %vm339_vm0, %v205_v0, 0  ;;  %s580_s27 = sshll.u32 %s1083_s26, 2  ;;  %v984_v20 = vld [vmem:[%s1074_s2] ss:$0 sm:$0xff]  ;;  %p840_p11 = scmp.ne.s32.totalorder %s838_s24, %s839_s25 }
  0x15   : > { %350 = vmatpush.bf16.msra.mxu0 %v341_v1  ;;  %778 = vmatpush.bf16.msra.mxu1 %v341_v1  ;;  %s169_s30 = scalar_lea.vmem %s1072_s0, %s580_s27  ;;  %s843_s28 = scalar_lea.hbm %s1075_s3, 256 }
  0x16   : > { %779 = vmatpush.bf16.msra.mxu2 %v341_v1  ;;  %780 = vmatpush.bf16.msra.mxu3 %v341_v1  ;;  %v666_v2 = vld [vmem:[%s169_s30] sm:$0xff]  ;;  %v667_v6 = vld [vmem:[%s169_s30 + $0x8] sm:$0xff]  ;;  %v668_v10 = vld [vmem:[%s169_s30 + $0x10] sm:$0xff]  ;;  %p841_p12 = pnand %p840_p11, %p947_p5  ;;  %p844_p0 = scmp.lt.s32.totalorder %s838_s24, %s1075_s3 }
  0x17   : > { %v670_v3 = vld [vmem:[%s169_s30 + $0x20] sm:$0xff]  ;;  %v671_v7 = vld [vmem:[%s169_s30 + $0x28] sm:$0xff]  ;;  %v672_v11 = vld [vmem:[%s169_s30 + $0x30] sm:$0xff]  ;;  %p845_p1 = scmp.lt.s32.totalorder %s843_s28, %s839_s25 }
  0x18   : > { %v674_v4 = vld [vmem:[%s169_s30 + $0x40] sm:$0xff]  ;;  %645 = vmatmul.msk.bf16.vlgmr.msra.gmra.mxu0 %vm290_vm1, %v666_v2  ;;  %649 = vmatmul.msk.bf16.vlgmr.msra.gmra.mxu1 %vm290_vm1, %v670_v3  ;;  %v675_v8 = vld [vmem:[%s169_s30 + $0x48] sm:$0xff]  ;;  %v676_v12 = vld [vmem:[%s169_s30 + $0x50] sm:$0xff]  ;;  %p842_p13 = pneg %p841_p12 }
  0x19   : > { %v678_v5 = vld [vmem:[%s169_s30 + $0x60] sm:$0xff]  ;;  %653 = vmatmul.msk.bf16.vlgmr.msra.gmra.mxu2 %vm290_vm1, %v674_v4  ;;  %v679_v9 = vld [vmem:[%s169_s30 + $0x68] sm:$0xff]  ;;  %v680_v13 = vld [vmem:[%s169_s30 + $0x70] sm:$0xff]  ;;  %p846_p2 = por %p845_p1, %p844_p0 }
  0x1a   : > { %657 = vmatmul.msk.bf16.vlgmr.msra.gmra.mxu3 %vm290_vm1, %v678_v5  ;;  %v669_v14 = vld [vmem:[%s169_s30 + $0x18] sm:$0xff] }
  0x1b   : > { %v673_v15 = vld [vmem:[%s169_s30 + $0x38] sm:$0xff]  ;;  %p847_p3 = pnand %p846_p2, %p842_p13 }
  0x1c   : > { %v677_v16 = vld [vmem:[%s169_s30 + $0x58] sm:$0xff] }
  0x1d   : > { %v681_v17 = vld [vmem:[%s169_s30 + $0x78] sm:$0xff] }
  0x28   : > { %646 = vmatmul.msk.bf16.gmra.mxu0 %vm290_vm1, %v667_v6  ;;  %650 = vmatmul.msk.bf16.gmra.mxu1 %vm290_vm1, %v671_v7 }
  0x29   : > { %654 = vmatmul.msk.bf16.gmra.mxu2 %vm290_vm1, %v675_v8 }
  0x2a   : > { %658 = vmatmul.msk.bf16.gmra.mxu3 %vm290_vm1, %v679_v9 }
  0x38   : > { %647 = vmatmul.msk.bf16.gmra.mxu0 %vm290_vm1, %v668_v10  ;;  %651 = vmatmul.msk.bf16.gmra.mxu1 %vm290_vm1, %v672_v11 }
  0x39   : > { %655 = vmatmul.msk.bf16.gmra.mxu2 %vm290_vm1, %v676_v12 }
  0x3a   : > { %659 = vmatmul.msk.bf16.gmra.mxu3 %vm290_vm1, %v680_v13 }
  0x48   : > { %648 = vmatmul.msk.bf16.gmra.mxu0 %vm290_vm1, %v669_v14  ;;  %652 = vmatmul.msk.bf16.gmra.mxu1 %vm290_vm1, %v673_v15 }
  0x49   : > { %656 = vmatmul.msk.bf16.gmra.mxu2 %vm290_vm1, %v677_v16 }
  0x4a   : > { %660 = vmatmul.msk.bf16.gmra.mxu3 %vm290_vm1, %v681_v17 }
  0x95   : > { %v352_v18 = vpop.f32.mrf.mxu0  ;;  %v372_v19 = vpop.f32.mrf.mxu1 }
  0x96   : > { %v353_v25 = vadd.f32 %v984_v20, %v352_v18  ;;  %v373_v26 = vadd.f32 %v984_v20, %v372_v19 }
  0x9c   : > { %v392_v21 = vpop.f32.mrf.mxu2 }
  0x9d   : > { %v412_v22 = vpop.f32.mrf.mxu3  ;;  %v354_v23 = vpop.f32.mrf.mxu0  ;;  %v393_v33 = vadd.f32 %v984_v20, %v392_v21 }
  0x9e   : > { %v374_v24 = vpop.f32.mrf.mxu1  ;;  %v355_v27 = vadd.f32 %v984_v20, %v354_v23  ;;  %v413_v34 = vadd.f32 %v984_v20, %v412_v22 }
  0x9f   : > { %v375_v28 = vadd.f32 %v984_v20, %v374_v24 }
  0xa0   : > { %v686_v29 = vpack.c.bf16 %v355_v27, %v353_v25 }
  0xa1   : > { %v706_v30 = vpack.c.bf16 %v375_v28, %v373_v26 }
  0xa2   : > { %687 = vst [vmem:[%s992_s8] sm:$0xff] %v686_v29  }
  0xa3   : > { %766 = vst [vmem:[%s992_s8 + $0x20] sm:$0xff] %v706_v30  }
  0xa4   : > { %v394_v31 = vpop.f32.mrf.mxu2 }
  0xa5   : > { %v414_v32 = vpop.f32.mrf.mxu3  ;;  %v395_v35 = vadd.f32 %v984_v20, %v394_v31  ;;  %v357_v37 = vpop.f32.mrf.mxu0 }
  0xa6   : > { %v415_v36 = vadd.f32 %v984_v20, %v414_v32  ;;  %v377_v38 = vpop.f32.mrf.mxu1  ;;  %v358_v45 = vadd.f32 %v984_v20, %v357_v37 }
  0xa7   : > { %v726_v39 = vpack.c.bf16 %v395_v35, %v393_v33  ;;  %v378_v46 = vadd.f32 %v984_v20, %v377_v38 }
  0xa8   : > { %v746_v40 = vpack.c.bf16 %v415_v36, %v413_v34 }
  0xa9   : > { %770 = vst [vmem:[%s992_s8 + $0x40] sm:$0xff] %v726_v39  }
  0xaa   : > { %774 = vst [vmem:[%s992_s8 + $0x60] sm:$0xff] %v746_v40  }
  0xac   : > { %v397_v41 = vpop.f32.mrf.mxu2 }
  0xad   : > { %v417_v42 = vpop.f32.mrf.mxu3  ;;  %v359_v43 = vpop.f32.mrf.mxu0  ;;  %v398_v53 = vadd.f32 %v984_v20, %v397_v41 }
  0xae   : > { %v379_v44 = vpop.f32.mrf.mxu1  ;;  %v360_v47 = vadd.f32 %v984_v20, %v359_v43  ;;  %v418_v54 = vadd.f32 %v984_v20, %v417_v42 }
  0xaf   : > { %v380_v48 = vadd.f32 %v984_v20, %v379_v44 }
  0xb0   : > { %v691_v49 = vpack.c.bf16 %v360_v47, %v358_v45 }
  0xb1   : > { %v711_v50 = vpack.c.bf16 %v380_v48, %v378_v46 }
  0xb2   : > { %763 = vst [vmem:[%s992_s8 + $0x8] sm:$0xff] %v691_v49  }
  0xb3   : > { %767 = vst [vmem:[%s992_s8 + $0x28] sm:$0xff] %v711_v50  }
  0xb4   : > { %v399_v51 = vpop.f32.mrf.mxu2 }
  0xb5   : > { %v419_v52 = vpop.f32.mrf.mxu3  ;;  %v400_v55 = vadd.f32 %v984_v20, %v399_v51  ;;  %v362_v57 = vpop.f32.mrf.mxu0 }
  0xb6   : > { %v420_v56 = vadd.f32 %v984_v20, %v419_v52  ;;  %v382_v58 = vpop.f32.mrf.mxu1  ;;  %v363_v1 = vadd.f32 %v984_v20, %v362_v57 }
  0xb7   : > { %v731_v59 = vpack.c.bf16 %v400_v55, %v398_v53  ;;  %v383_v2 = vadd.f32 %v984_v20, %v382_v58 }
  0xb8   : > { %v751_v60 = vpack.c.bf16 %v420_v56, %v418_v54 }
  0xb9   : > { %771 = vst [vmem:[%s992_s8 + $0x48] sm:$0xff] %v731_v59  }
  0xba   : > { %775 = vst [vmem:[%s992_s8 + $0x68] sm:$0xff] %v751_v60  }
  0xbc   : > { %v402_v61 = vpop.f32.mrf.mxu2 }
  0xbd   : > { %v422_v62 = vpop.f32.mrf.mxu3  ;;  %v364_v63 = vpop.f32.mrf.mxu0  ;;  %v403_v9 = vadd.f32 %v984_v20, %v402_v61 }
  0xbe   : > { %v384_v0 = vpop.f32.mrf.mxu1  ;;  %v365_v3 = vadd.f32 %v984_v20, %v364_v63  ;;  %v423_v10 = vadd.f32 %v984_v20, %v422_v62 }
  0xbf   : > { %v385_v4 = vadd.f32 %v984_v20, %v384_v0 }
  0xc0   : > { %v696_v5 = vpack.c.bf16 %v365_v3, %v363_v1 }
  0xc1   : > { %v716_v6 = vpack.c.bf16 %v385_v4, %v383_v2 }
  0xc2   : > { %764 = vst [vmem:[%s992_s8 + $0x10] sm:$0xff] %v696_v5  }
  0xc3   : > { %768 = vst [vmem:[%s992_s8 + $0x30] sm:$0xff] %v716_v6  }
  0xc4   : > { %v404_v7 = vpop.f32.mrf.mxu2 }
  0xc5   : > { %v424_v8 = vpop.f32.mrf.mxu3  ;;  %v405_v11 = vadd.f32 %v984_v20, %v404_v7  ;;  %v367_v13 = vpop.f32.mrf.mxu0 }
  0xc6   : > { %v425_v12 = vadd.f32 %v984_v20, %v424_v8  ;;  %v387_v14 = vpop.f32.mrf.mxu1  ;;  %v368_v22 = vadd.f32 %v984_v20, %v367_v13 }
  0xc7   : > { %v736_v15 = vpack.c.bf16 %v405_v11, %v403_v9  ;;  %v388_v23 = vadd.f32 %v984_v20, %v387_v14 }
  0xc8   : > { %v756_v16 = vpack.c.bf16 %v425_v12, %v423_v10 }
  0xc9   : > { %772 = vst [vmem:[%s992_s8 + $0x50] sm:$0xff] %v736_v15  }
  0xca   : > { %776 = vst [vmem:[%s992_s8 + $0x70] sm:$0xff] %v756_v16  }
  0xcc   : > { %v407_v17 = vpop.f32.mrf.mxu2 }
  0xcd   : > { %v427_v18 = vpop.f32.mrf.mxu3  ;;  %v369_v19 = vpop.f32.mrf.mxu0  ;;  %v408_v30 = vadd.f32 %v984_v20, %v407_v17 }
  0xce   : > { %v389_v21 = vpop.f32.mrf.mxu1  ;;  %v370_v24 = vadd.f32 %v984_v20, %v369_v19  ;;  %v428_v31 = vadd.f32 %v984_v20, %v427_v18 }
  0xcf   : > { %v390_v25 = vadd.f32 %v984_v20, %v389_v21 }
  0xd0   : > { %v701_v26 = vpack.c.bf16 %v370_v24, %v368_v22 }
  0xd1   : > { %v721_v27 = vpack.c.bf16 %v390_v25, %v388_v23 }
  0xd2   : > { %765 = vst [vmem:[%s992_s8 + $0x18] sm:$0xff] %v701_v26  }
  0xd3   : > { %769 = vst [vmem:[%s992_s8 + $0x38] sm:$0xff] %v721_v27  }
  0xd4   : > { %v409_v28 = vpop.f32.mrf.mxu2 }
  0xd5   : > { %v429_v29 = vpop.f32.mrf.mxu3  ;;  %v410_v32 = vadd.f32 %v984_v20, %v409_v28 }
  0xd6   : > { %v430_v33 = vadd.f32 %v984_v20, %v429_v29 }
  0xd7   : > { %v741_v34 = vpack.c.bf16 %v410_v32, %v408_v30 }
  0xd8   : > { %v761_v35 = vpack.c.bf16 %v430_v33, %v428_v31 }
  0xd9   : > { %773 = vst [vmem:[%s992_s8 + $0x58] sm:$0xff] %v741_v34  }
  0xda   : > { %777 = vst [vmem:[%s992_s8 + $0x78] sm:$0xff] %v761_v35  }
  0xdb   : > { %850 = shalt.err (!%p847_p3)
}
  0xdc   : > { %s887_s4 = smov 64   ;;  %s888_s5 = smov 4  }
  0xdd   : > { %781 = dma.vmem_to_hbm [thread:$0]  (%p947_p5), %s510_s19, 2048, %s512_s20, %s497_s16, %s887_s4, %s887_s4, %s888_s5  }
  0xde PF: > { %p787_p4 = scmp.ge.s32.totalorder %s885_s15, 2  ;;  %s526_s6 = sand.u32 1, %s873_s12  }
  0xdf   : > { %s527_s7 = scalar_lea.sflag [#allocation3], %s526_s6 }
  0xe0   : > { %p784_p7 = pnand %p787_p4, %p951_p6 }
  0xe2   : > { %p785_p8 = pneg %p784_p7 }
  0xe4   : > { %868 = dma.done.wait (%p785_p8), %s527_s7, 2048  }
  0xe5   : > { %870 = vsyncadd (%p785_p8), %s527_s7, 4294965248  ;;  %p13_p9 = scmp.ge.s32.totalorder %s934_s18, 4   ;;  %s1078_s12 = smov %s877_s13 }
  0xe6   : > { %s1079_s13 = smov %s881_s14  ;;  %s1080_s14 = smov %s945_s21 }
  0xe7   : > { %s1081_s15 = smov %s934_s18  ;;  %15 = sbr.rel (!%p13_p9) target bundleno = 3 (0x3), region = 67 }
  0xec   :  { %533 = vsyncpa [#allocation3], 1 }
  0xed   :  { %535 = vsyncpa [#allocation3 + $0x1], 1 }

</bundles_post_ra>
